<compile_context>
chip_gen: v6e
topology: v6e:2x2x1
jax: 0.10.0
libtpu: 0.0.40
codegen_flags: <defaults>
</compile_context>

<pallas_src>
import jax
import jax.numpy as jnp
from jax.experimental import pallas as pl
from jax.experimental.pallas import tpu as pltpu


H_PAD = 128          # padded hidden width (lane-dense); h_size <= 128
MAX_TILE_B = 1024    # rows per grid step (multiple of 512; amortizes per-step overhead)


def _round_up(x, m):
    return ((x + m - 1) // m) * m


def _mlp_kernel(x_ref, w1_ref, w2_ref, w3_ref, b1_ref, b2_ref, b3_ref, o_ref):
    # x_ref:  (TILE_B, n_in)   f32   (batch-tiled)
    # w1_ref: (n_in,  H_PAD)   bf16  (resident)
    # w2_ref: (H_PAD, H_PAD)   bf16  (resident)
    # w3_ref: (H_PAD, n_out)   bf16  (resident)
    # b1_ref: (1, H_PAD) f32, b2_ref: (1, H_PAD) f32, b3_ref: (1, n_out) f32
    # o_ref:  (TILE_B, n_out)  f32
    x = x_ref[...].astype(jnp.bfloat16)   # cast in-kernel (no wrapper pad/cast pass)

    # fc1 + relu  (bf16 MXU, f32 accumulate, f32 elementwise)
    h = jnp.dot(x, w1_ref[...], preferred_element_type=jnp.float32)
    h = jnp.maximum(h + b1_ref[...], 0.0)

    # fc2 + relu
    h = jnp.dot(h.astype(jnp.bfloat16), w2_ref[...], preferred_element_type=jnp.float32)
    h = jnp.maximum(h + b2_ref[...], 0.0)

    # fc3 + sigmoid + 0.6  (narrow n_out-wide output store)
    h = jnp.dot(h.astype(jnp.bfloat16), w3_ref[...], preferred_element_type=jnp.float32)
    o_ref[...] = jax.nn.sigmoid(h + b3_ref[...]) + 0.6


def pack_params(w1, b1, w2, b2, w3, b3):
    """One-time packing: zero-pad hidden dim to H_PAD, bf16 weights, f32 biases.
    Weights are stored (in, out) so the forward computes x @ W (== PyTorch x @ W.T)."""
    n_in, h = w1.shape
    n_out = w3.shape[1]
    assert h <= H_PAD and n_out <= H_PAD
    w1p = jnp.pad(w1, ((0, 0), (0, H_PAD - h))).astype(jnp.bfloat16)           # (n_in, 128)
    w2p = jnp.pad(w2, ((0, H_PAD - h), (0, H_PAD - h))).astype(jnp.bfloat16)   # (128, 128)
    w3p = jnp.pad(w3, ((0, H_PAD - h), (0, 0))).astype(jnp.bfloat16)           # (128, n_out)
    b1p = jnp.pad(b1, (0, H_PAD - h)).astype(jnp.float32)[None, :]             # (1, 128)
    b2p = jnp.pad(b2, (0, H_PAD - h)).astype(jnp.float32)[None, :]             # (1, 128)
    b3p = b3.astype(jnp.float32)[None, :]                                      # (1, n_out)
    return (w1p, w2p, w3p, b1p, b2p, b3p)


@jax.jit
def network_forward(x, params):
    """Forward pass of the 3-layer MLP, batched over a grid of row tiles."""
    w1p, w2p, w3p, b1p, b2p, b3p = params
    B, n_in = x.shape
    n_out = w3p.shape[1]

    # ---- tile geometry (static at trace time) ----
    # Multiple of 16 rows (bf16 packs 16 sublanes per vreg); cap at MAX_TILE_B so
    # large batches get multiple "parallel" grid steps (v7x dual-TC friendly).
    tile_b = min(MAX_TILE_B, _round_up(B, 16))
    padded_b = _round_up(B, tile_b)
    grid = (padded_b // tile_b,)

    x_p = jnp.pad(x, ((0, padded_b - B), (0, 0)))   # rows only; stays f32, n_in lanes

    out_padded = pl.pallas_call(
        _mlp_kernel,
        out_shape=jax.ShapeDtypeStruct((padded_b, n_out), jnp.float32),
        grid=grid,
        in_specs=[
            pl.BlockSpec((tile_b, n_in), lambda i: (i, 0)),       # x: tiled over batch
            pl.BlockSpec((n_in, H_PAD), lambda i: (0, 0)),        # w1: resident
            pl.BlockSpec((H_PAD, H_PAD), lambda i: (0, 0)),       # w2: resident
            pl.BlockSpec((H_PAD, n_out), lambda i: (0, 0)),       # w3: resident
            pl.BlockSpec((1, H_PAD), lambda i: (0, 0)),           # b1: resident
            pl.BlockSpec((1, H_PAD), lambda i: (0, 0)),           # b2: resident
            pl.BlockSpec((1, n_out), lambda i: (0, 0)),           # b3: resident
        ],
        out_specs=pl.BlockSpec((tile_b, n_out), lambda i: (i, 0)),
        compiler_params=pltpu.CompilerParams(
            dimension_semantics=("parallel",),
            vmem_limit_bytes=32 * 1024 * 1024,
        ),
    )(x_p, w1p, w2p, w3p, b1p, b2p, b3p)

    return out_padded[:B, :]


def init_linear_params(key, fan_in, fan_out):
    """Deterministic init mirroring torch.nn.Linear: U(-1/sqrt(fan_in), 1/sqrt(fan_in)).
    Weights stored as (in, out) so forward computes x @ W (== PyTorch x @ W.T)."""
    kw, kb = jax.random.split(key)
    bound = 1.0 / jnp.sqrt(jnp.float32(fan_in))
    w = jax.random.uniform(kw, (fan_in, fan_out), jnp.float32, -bound, bound)
    b = jax.random.uniform(kb, (fan_out,), jnp.float32, -bound, bound)
    return w, b


def reference_forward(x, w1, b1, w2, b2, w3, b3):
    h = jnp.maximum(x @ w1 + b1, 0.0)
    h = jnp.maximum(h @ w2 + b2, 0.0)
    h = h @ w3 + b3
    return jax.nn.sigmoid(h) + 0.6


if __name__ == "__main__":
    # Shapes consistent with the module: Network(n_in=16, h_size=32, n_out=8)
    n_in, h_size, n_out = 16, 32, 8

    key = jax.random.PRNGKey(0)
    kx, k1, k2, k3, kx2 = jax.random.split(key, 5)

    w1, b1 = init_linear_params(k1, n_in, h_size)
    w2, b2 = init_linear_params(k2, h_size, h_size)
    w3, b3 = init_linear_params(k3, h_size, n_out)

    params = jax.block_until_ready(pack_params(w1, b1, w2, b2, w3, b3))  # packed once

    # --- small batch (single-tile path) ---
    batch = 8
    x = jax.random.normal(kx, (batch, n_in), jnp.float32)
    out = jax.block_until_ready(network_forward(x, params))
    ref = reference_forward(x, w1, b1, w2, b2, w3, b3)
    assert out.shape == (batch, n_out)
    assert jnp.allclose(out, ref, atol=2e-2, rtol=2e-2), float(jnp.max(jnp.abs(out - ref)))

    # --- larger, ragged batch (exercises the batch grid + row padding) ---
    batch2 = 300
    x2 = jax.random.normal(kx2, (batch2, n_in), jnp.float32)
    out2 = jax.block_until_ready(network_forward(x2, params))
    ref2 = reference_forward(x2, w1, b1, w2, b2, w3, b3)
    assert out2.shape == (batch2, n_out)
    assert jnp.allclose(out2, ref2, atol=2e-2, rtol=2e-2), float(jnp.max(jnp.abs(out2 - ref2)))

    print("KERNEL_OK")
</pallas_src>

<mosaic_0001>
module attributes {stable_mosaic.version = 11 : i64} {
  func.func @_mlp_kernel(%arg0: i32, %arg1: memref<16x16xf32, #tpu.memory_space<vmem>>, %arg2: memref<16x128xbf16, #tpu.memory_space<vmem>>, %arg3: memref<128x128xbf16, #tpu.memory_space<vmem>>, %arg4: memref<128x8xbf16, #tpu.memory_space<vmem>>, %arg5: memref<1x128xf32, #tpu.memory_space<vmem>>, %arg6: memref<1x128xf32, #tpu.memory_space<vmem>>, %arg7: memref<1x8xf32, #tpu.memory_space<vmem>>, %arg8: memref<16x8xf32, #tpu.memory_space<vmem>>) attributes {dimension_semantics = [#tpu.dimension_semantics<parallel>], iteration_bounds = array<i64: 1>, scalar_prefetch = 0 : i64, scratch_operands = 0 : i64, tpu.core_type = #tpu.core_type<tc>, window_params = [{transform_indices = @transform_0, window_bounds = array<i64: 16, 16>}, {pipeline_mode = #tpu.pipeline_mode<synchronous>, transform_indices = @transform_1, window_bounds = array<i64: 16, 128>}, {pipeline_mode = #tpu.pipeline_mode<synchronous>, transform_indices = @transform_2, window_bounds = array<i64: 128, 128>}, {pipeline_mode = #tpu.pipeline_mode<synchronous>, transform_indices = @transform_3, window_bounds = array<i64: 128, 8>}, {pipeline_mode = #tpu.pipeline_mode<synchronous>, transform_indices = @transform_4, window_bounds = array<i64: 1, 128>}, {pipeline_mode = #tpu.pipeline_mode<synchronous>, transform_indices = @transform_5, window_bounds = array<i64: 1, 128>}, {pipeline_mode = #tpu.pipeline_mode<synchronous>, transform_indices = @transform_6, window_bounds = array<i64: 1, 8>}, {transform_indices = @transform_7, window_bounds = array<i64: 16, 8>}]} {
    %c0 = arith.constant 0 : index
    %c0_0 = arith.constant 0 : index
    %0 = vector.load %arg1[%c0, %c0_0] : memref<16x16xf32, #tpu.memory_space<vmem>>, vector<16x16xf32>
    %1 = arith.truncf %0 : vector<16x16xf32> to vector<16x16xbf16>
    %c0_1 = arith.constant 0 : index
    %c0_2 = arith.constant 0 : index
    %2 = vector.load %arg2[%c0_1, %c0_2] : memref<16x128xbf16, #tpu.memory_space<vmem>>, vector<16x128xbf16>
    %cst = arith.constant dense<0.000000e+00> : vector<16x128xf32>
    %3 = tpu.matmul %1, %2, %cst {dimension_numbers = #tpu.dot_dimension_numbers<[1], [0], [0], [1], [0, 0, 1, 1], [], []>} : vector<16x16xbf16>, vector<16x128xbf16>, vector<16x128xf32> -> vector<16x128xf32>
    %c0_3 = arith.constant 0 : index
    %c0_4 = arith.constant 0 : index
    %4 = vector.load %arg5[%c0_3, %c0_4] : memref<1x128xf32, #tpu.memory_space<vmem>>, vector<1x128xf32>
    %5 = vector.broadcast %4 : vector<1x128xf32> to vector<16x128xf32>
    %6 = arith.addf %3, %5 : vector<16x128xf32>
    %cst_5 = arith.constant 0.000000e+00 : f32
    %7 = vector.broadcast %cst_5 : f32 to vector<16x128xf32>
    %8 = arith.maximumf %6, %7 : vector<16x128xf32>
    %9 = arith.truncf %8 : vector<16x128xf32> to vector<16x128xbf16>
    %c0_6 = arith.constant 0 : index
    %c0_7 = arith.constant 0 : index
    %10 = vector.load %arg3[%c0_6, %c0_7] : memref<128x128xbf16, #tpu.memory_space<vmem>>, vector<128x128xbf16>
    %cst_8 = arith.constant dense<0.000000e+00> : vector<16x128xf32>
    %11 = tpu.matmul %9, %10, %cst_8 {dimension_numbers = #tpu.dot_dimension_numbers<[1], [0], [0], [1], [0, 0, 1, 1], [], []>} : vector<16x128xbf16>, vector<128x128xbf16>, vector<16x128xf32> -> vector<16x128xf32>
    %c0_9 = arith.constant 0 : index
    %c0_10 = arith.constant 0 : index
    %12 = vector.load %arg6[%c0_9, %c0_10] : memref<1x128xf32, #tpu.memory_space<vmem>>, vector<1x128xf32>
    %13 = vector.broadcast %12 : vector<1x128xf32> to vector<16x128xf32>
    %14 = arith.addf %11, %13 : vector<16x128xf32>
    %cst_11 = arith.constant 0.000000e+00 : f32
    %15 = vector.broadcast %cst_11 : f32 to vector<16x128xf32>
    %16 = arith.maximumf %14, %15 : vector<16x128xf32>
    %17 = arith.truncf %16 : vector<16x128xf32> to vector<16x128xbf16>
    %c0_12 = arith.constant 0 : index
    %c0_13 = arith.constant 0 : index
    %18 = vector.load %arg4[%c0_12, %c0_13] : memref<128x8xbf16, #tpu.memory_space<vmem>>, vector<128x8xbf16>
    %cst_14 = arith.constant dense<0.000000e+00> : vector<16x8xf32>
    %19 = tpu.matmul %17, %18, %cst_14 {dimension_numbers = #tpu.dot_dimension_numbers<[1], [0], [0], [1], [0, 0, 1, 1], [], []>} : vector<16x128xbf16>, vector<128x8xbf16>, vector<16x8xf32> -> vector<16x8xf32>
    %c0_15 = arith.constant 0 : index
    %c0_16 = arith.constant 0 : index
    %20 = vector.load %arg7[%c0_15, %c0_16] : memref<1x8xf32, #tpu.memory_space<vmem>>, vector<1x8xf32>
    %21 = vector.broadcast %20 : vector<1x8xf32> to vector<16x8xf32>
    %22 = arith.addf %19, %21 : vector<16x8xf32>
    %23 = arith.negf %22 : vector<16x8xf32>
    %24 = math.exp %23 : vector<16x8xf32>
    %cst_17 = arith.constant 1.000000e+00 : f32
    %25 = vector.broadcast %cst_17 : f32 to vector<16x8xf32>
    %26 = arith.addf %25, %24 : vector<16x8xf32>
    %27 = arith.divf %25, %26 : vector<16x8xf32>
    %cst_18 = arith.constant 6.000000e-01 : f32
    %28 = vector.broadcast %cst_18 : f32 to vector<16x8xf32>
    %29 = arith.addf %27, %28 : vector<16x8xf32>
    %c0_19 = arith.constant 0 : index
    %c0_20 = arith.constant 0 : index
    %30 = vector.load %arg8[%c0_19, %c0_20] : memref<16x8xf32, #tpu.memory_space<vmem>>, vector<16x8xf32>
    tpu.vector_store %arg8[%c0_19, %c0_20], %29 {strides = array<i32>} : memref<16x8xf32, #tpu.memory_space<vmem>>, vector<16x8xf32>,
    return
  }
  func.func @transform_0(%arg0: i32) -> (i32, i32) {
    %c0_i32 = arith.constant 0 : i32
    %c0_i32_0 = arith.constant 0 : i32
    return %arg0, %c0_i32 : i32, i32
  }
  func.func @transform_1(%arg0: i32) -> (i32, i32) {
    %c0_i32 = arith.constant 0 : i32
    %c0_i32_0 = arith.constant 0 : i32
    %c0_i32_1 = arith.constant 0 : i32
    return %c0_i32, %c0_i32_0 : i32, i32
  }
  func.func @transform_2(%arg0: i32) -> (i32, i32) {
    %c0_i32 = arith.constant 0 : i32
    %c0_i32_0 = arith.constant 0 : i32
    %c0_i32_1 = arith.constant 0 : i32
    return %c0_i32, %c0_i32_0 : i32, i32
  }
  func.func @transform_3(%arg0: i32) -> (i32, i32) {
    %c0_i32 = arith.constant 0 : i32
    %c0_i32_0 = arith.constant 0 : i32
    %c0_i32_1 = arith.constant 0 : i32
    return %c0_i32, %c0_i32_0 : i32, i32
  }
  func.func @transform_4(%arg0: i32) -> (i32, i32) {
    %c0_i32 = arith.constant 0 : i32
    %c0_i32_0 = arith.constant 0 : i32
    %c0_i32_1 = arith.constant 0 : i32
    return %c0_i32, %c0_i32_0 : i32, i32
  }
  func.func @transform_5(%arg0: i32) -> (i32, i32) {
    %c0_i32 = arith.constant 0 : i32
    %c0_i32_0 = arith.constant 0 : i32
    %c0_i32_1 = arith.constant 0 : i32
    return %c0_i32, %c0_i32_0 : i32, i32
  }
  func.func @transform_6(%arg0: i32) -> (i32, i32) {
    %c0_i32 = arith.constant 0 : i32
    %c0_i32_0 = arith.constant 0 : i32
    %c0_i32_1 = arith.constant 0 : i32
    return %c0_i32, %c0_i32_0 : i32, i32
  }
  func.func @transform_7(%arg0: i32) -> (i32, i32) {
    %c0_i32 = arith.constant 0 : i32
    %c0_i32_0 = arith.constant 0 : i32
    return %arg0, %c0_i32 : i32, i32
  }
}

</mosaic_0001>

<bundles_post_ra>
// kernel: network_forward.1
= control target key start
LH: loop header
LB: loop body
LE: loop exit
PB: predicated region body
PF: predicated region fallthrough
CT: control target
= control target key end

     0   :  { %v457_v0 = vmov 0.0   ;;  %vm458_vm0 = vmmov 0   ;;  %vm45_vm1 = vcmask 130048   ;;  %vm334_vm2 = vcmask 64512   ;;  %s594_s1 = inlined_call_operand.vmem [shape: bf16[16,128], index: 1, kind: input, shape index: {}]   ;;  %s595_s0 = inlined_call_operand.vmem [shape: f32[16,16], index: 0, kind: input, shape index: {}]   ;;  %s596_s2 = inlined_call_operand.vmem [shape: bf16[128,128], index: 2, kind: input, shape index: {}]   ;;  %s597_s3 = inlined_call_operand.vmem [shape: bf16[128,8], index: 3, kind: input, shape index: {}]   ;;  %s598_s4 = inlined_call_operand.vmem [shape: f32[1,128], index: 4, kind: input, shape index: {}]   ;;  %s599_s5 = inlined_call_operand.vmem [shape: f32[1,128], index: 5, kind: input, shape index: {}]   ;;  %s600_s6 = inlined_call_operand.vmem [shape: f32[1,8], index: 6, kind: input, shape index: {}]   ;;  %s601_s7 = inlined_call_operand.vmem [shape: f32[16,8], index: 7, kind: output, shape index: {}]  }
   0x1   :  { %384 = vmatprep.subr.bf16.mxu0 %v457_v0  ;;  %v432_v1 = vld [vmem:[%s594_s1] sm:$0xff]   ;;  %386 = vmatprep.mubr.msk.bf16.mxu0 %vm458_vm0, %v457_v0  ;;  %v28_v3 = vld [vmem:[%s595_s0 + $0x8] sm:$0xff]  ;;  %v433_v5 = vld [vmem:[%s596_s2 + $0x38] sm:$0xff]  }
   0x2   :  { %v27_v2 = vld [vmem:[%s595_s0] sm:$0xff]  ;;  %390 = vmatprep.subr.bf16.mxu1 %v457_v0  ;;  %406 = vmatprep.mubr.msk.bf16.mxu1 %vm458_vm0, %v457_v0  ;;  %v434_v6 = vld [vmem:[%s596_s2 + $0x30] sm:$0xff]   ;;  %v435_v7 = vld [vmem:[%s596_s2 + $0x28] sm:$0xff]  }
   0x3   :  { %385 = vmatpush3.bf16.msra.mxu0 %v432_v1  ;;  %v29_v4 = vpack.c.bf16 %v28_v3, %v27_v2  ;;  %391 = vmatpush3.bf16.msra.mxu1 %v433_v5  ;;  %v436_v8 = vld [vmem:[%s596_s2 + $0x20] sm:$0xff]   ;;  %v437_v9 = vld [vmem:[%s596_s2 + $0x18] sm:$0xff]   ;;  %v438_v10 = vld [vmem:[%s596_s2 + $0x10] sm:$0xff]  }
   0x4   :  { %410 = vmatprep.subr.bf16.mxu0 %v457_v0  ;;  %392 = vmatprep.subr.bf16.mxu1 %v457_v0  ;;  %v439_v11 = vld [vmem:[%s596_s2 + $0x8] sm:$0xff]   ;;  %v440_v12 = vld [vmem:[%s596_s2] sm:$0xff]   ;;  %v441_v13 = vld [vmem:[%s597_s3 + $0x38] sm:$0xff]  }
   0x5   :  { %v442_v14 = vld [vmem:[%s597_s3 + $0x30] sm:$0xff]   ;;  %v443_v15 = vld [vmem:[%s597_s3 + $0x28] sm:$0xff]   ;;  %v444_v16 = vld [vmem:[%s597_s3 + $0x20] sm:$0xff]  }
   0x6   :  { %387 = vmatmul.mubr.msk.bf16.vlgmr.msra.gmra.mxu0 %vm45_vm1, %v29_v4  ;;  %v445_v17 = vld [vmem:[%s597_s3 + $0x18] sm:$0xff]   ;;  %v341_v18 = vld [vmem:[%s598_s4] ss:$0 sm:$0xff]  ;;  %v446_v28 = vld [vmem:[%s597_s3 + $0x10] sm:$0xff]  }
   0x7   :  { %426 = vmatprep.mubr.msk.bf16.mxu0 %vm458_vm0, %v457_v0  ;;  %393 = vmatpush3.bf16.msra.mxu1 %v434_v6  ;;  %v447_v29 = vld [vmem:[%s597_s3 + $0x8] sm:$0xff]   ;;  %v448_v30 = vld [vmem:[%s597_s3] sm:$0xff]  }
   0x8   :  { %394 = vmatprep.subr.bf16.mxu1 %v457_v0  ;;  %411 = vmatpush3.bf16.msra.mxu0 %v441_v13  ;;  %v344_v31 = vld [vmem:[%s599_s5] ss:$0 sm:$0xff] }
   0x9   :  { %412 = vmatprep.subr.bf16.mxu0 %v457_v0  ;;  %v353_v41 = vld [vmem:[%s600_s6] ss:$0 sm:$0xff] }
   0xb   :  { %395 = vmatpush3.bf16.msra.mxu1 %v435_v7 }
   0xc   :  { %396 = vmatprep.subr.bf16.mxu1 %v457_v0  ;;  %413 = vmatpush3.bf16.msra.mxu0 %v442_v14 }
   0xd   :  { %414 = vmatprep.subr.bf16.mxu0 %v457_v0 }
   0xf   :  { %397 = vmatpush3.bf16.msra.mxu1 %v436_v8 }
  0x10   :  { %398 = vmatprep.subr.bf16.mxu1 %v457_v0  ;;  %415 = vmatpush3.bf16.msra.mxu0 %v443_v15 }
  0x11   :  { %416 = vmatprep.subr.bf16.mxu0 %v457_v0 }
  0x13   :  { %399 = vmatpush3.bf16.msra.mxu1 %v437_v9 }
  0x14   :  { %400 = vmatprep.subr.bf16.mxu1 %v457_v0  ;;  %417 = vmatpush3.bf16.msra.mxu0 %v444_v16 }
  0x15   :  { %418 = vmatprep.subr.bf16.mxu0 %v457_v0 }
  0x17   :  { %401 = vmatpush3.bf16.msra.mxu1 %v438_v10 }
  0x18   :  { %402 = vmatprep.subr.bf16.mxu1 %v457_v0  ;;  %419 = vmatpush3.bf16.msra.mxu0 %v445_v17 }
  0x19   :  { %420 = vmatprep.subr.bf16.mxu0 %v457_v0 }
  0x1b   :  { %403 = vmatpush3.bf16.msra.mxu1 %v439_v11 }
  0x1c   :  { %404 = vmatprep.subr.bf16.mxu1 %v457_v0  ;;  %421 = vmatpush3.bf16.msra.mxu0 %v446_v28 }
  0x1d   :  { %422 = vmatprep.subr.bf16.mxu0 %v457_v0 }
  0x1f   :  { %405 = vmatpush3.bf16.msra.mxu1 %v440_v12 }
  0x20   :  { %423 = vmatpush3.bf16.msra.mxu0 %v447_v29 }
  0x21   :  { %424 = vmatprep.subr.bf16.mxu0 %v457_v0 }
  0x24   :  { %425 = vmatpush3.bf16.msra.mxu0 %v448_v30 }
  0xc6   :  { %v83_v19 = vpop.f32.mrf.mxu0 }
  0xc7   :  { %v84_v21 = vadd.f32 %v341_v18, %v83_v19 }
  0xc8   :  { %v388_v20 = vpop.f32.mrf.mxu0 }
  0xc9   :  { %v90_v25 = vmax.f32 %v84_v21, 0.0 }
  0xca   :  { %v86_v22 = vpop.f32.mrf.mxu0 }
  0xcb   :  { %v87_v23 = vadd.f32 %v341_v18, %v86_v22 }
  0xcc   :  { %v389_v24 = vpop.f32.mrf.mxu0 }
  0xcd   :  { %v91_v26 = vmax.f32 %v87_v23, 0.0 }
  0xcf   :  { %v92_v27 = vpack.c.bf16 %v91_v26, %v90_v25 }
  0xd1   :  { %407 = vmatmul.mubr.bf16.vlgmr.msra.gmra.mxu1 %v92_v27 }
 0x191   :  { %v198_v32 = vpop.f32.mrf.mxu1 }
 0x192   :  { %v199_v34 = vadd.f32 %v344_v31, %v198_v32 }
 0x193   :  { %v408_v33 = vpop.f32.mrf.mxu1 }
 0x194   :  { %v205_v38 = vmax.f32 %v199_v34, 0.0 }
 0x195   :  { %v201_v35 = vpop.f32.mrf.mxu1 }
 0x196   :  { %v202_v36 = vadd.f32 %v344_v31, %v201_v35 }
 0x197   :  { %v409_v37 = vpop.f32.mrf.mxu1 }
 0x198   :  { %v206_v39 = vmax.f32 %v202_v36, 0.0 }
 0x19a   :  { %v207_v40 = vpack.c.bf16 %v206_v39, %v205_v38 }
 0x19c   :  { %427 = vmatmul.mubr.bf16.vlgmr.msra.gmra.mxu0 %v207_v40 }
 0x25c   :  { %v313_v42 = vpop.f32.mrf.mxu0 }
 0x25d   :  { %v314_v43 = vadd.f32 %v353_v41, %v313_v42 }
 0x25e   :  { %v428_v44 = vpop.f32.mrf.mxu0 }
 0x25f   :  { %v362_v45 = vmul.f32 -1.442695, %v314_v43 }
 0x260   :  { %v316_v46 = vpop.f32.mrf.mxu0 }
 0x261   :  { %449 = vpow2.f32 %v362_v45  ;;  %v317_v47 = vadd.f32 %v353_v41, %v316_v46 }
 0x262   :  { %v429_v48 = vpop.f32.mrf.mxu0 }
 0x263   :  { %v363_v49 = vmul.f32 -1.442695, %v317_v47 }
 0x265   :  { %451 = vpow2.f32 %v363_v49 }
 0x26e   :  { %v450_v50 = vpop.eup %449 }
 0x26f   :  { %v326_v51 = vadd.f32 1.0, %v450_v50 }
 0x271   :  { %453 = vrcp.f32 %v326_v51 }
 0x272   :  { %v452_v52 = vpop.eup %451 }
 0x273   :  { %v327_v53 = vadd.f32 1.0, %v452_v52 }
 0x275   :  { %455 = vrcp.f32 %v327_v53 }
 0x27e   :  { %v454_v54 = vpop.eup %453 }
 0x27f   :  { %v332_v55 = vadd.f32 0.6, %v454_v54 }
 0x281   :  { %335 = vst.msk [vmem:[%s601_s7] sm:$0xff] %vm334_vm2, %v332_v55 }
 0x282   :  { %v456_v56 = vpop.eup %455 }
 0x283   :  { %v333_v57 = vadd.f32 0.6, %v456_v56 }
 0x285   :  { %336 = vst.msk [vmem:[%s601_s7 + $0x8] sm:$0xff] %vm334_vm2, %v333_v57 }

</bundles_post_ra>
